<compile_context>
chip_gen: v7x
topology: tpu7x:2x2x1
jax: 0.10.0
libtpu: 0.0.40
codegen_flags: <defaults>
</compile_context>

<pallas_src>
import functools

import jax
import jax.numpy as jnp
import numpy as np
from jax import lax
from jax.experimental import pallas as pl
from jax.experimental.pallas import tpu as pltpu

ELEM_FEA_LEN = 32
GATE_HIDDEN = 16
MSG_HIDDEN = 16
N_NODES = 16
N_GRAPHS = 2
LN_EPS = 1e-5

LANE = 128
SUB = 8

_SELU_ALPHA = 1.6732632423543772
_SELU_SCALE = 1.0507009873554805
_NEG_BIG = -1e30

# Generous but v7x-safe scoped-VMEM allowance for the default 2048-row tile.
_VMEM_LIMIT = 48 * 1024 * 1024


def _round_up(x, m):
    return (x + m - 1) // m * m


def _selu(v):
    return _SELU_SCALE * jnp.where(v > 0, v, _SELU_ALPHA * (jnp.exp(v) - 1.0))


# ---------------------------------------------------------------------------
# Kernel A: single streaming pass over x -> per-graph exp-sum + unnormalized
# context via online segment softmax (resident accumulator outputs).
# ---------------------------------------------------------------------------
def _accum_kernel(x_ref, bid_ref, w1_ref, w2_ref, v_ref,
                  segsum_ref, ctx_ref, segmax_ref, *, f, kh):
    tile = pl.program_id(0)
    t = x_ref.shape[0]
    gp = segsum_ref.shape[1]

    @pl.when(tile == 0)
    def _():
        segmax_ref[...] = jnp.full(segmax_ref.shape, _NEG_BIG, segmax_ref.dtype)
        segsum_ref[...] = jnp.zeros(segsum_ref.shape, segsum_ref.dtype)
        ctx_ref[...] = jnp.zeros(ctx_ref.shape, ctx_ref.dtype)

    xf = x_ref[...].astype(jnp.float32)                       # [t, f]  true F lanes
    hid_b = v_ref[0:1, 0:kh]        # gate_b1 | msg_b1 packed into one row
    g2row = v_ref[1:2, 0:kh]        # gate_w2 as a row (msg-hidden cols are zero)
    mb2 = v_ref[2:3, 0:f]
    gb2 = v_ref[5:6, 0:1]

    # Both hidden projections in one MXU pass; SELU with the combined bias.
    h = _selu(jnp.dot(xf, w1_ref[...],
                      preferred_element_type=jnp.float32) + hid_b)     # [t, kh]
    # [t,kh]x[kh,1] gate projection as a VPU lane reduce (g2row's msg-hidden
    # columns are zero, so they contribute nothing).
    gate = jnp.sum(h * g2row, axis=-1, keepdims=True) + gb2            # [t, 1]
    # msg projection: w2 rows for the gate hidden are zero -> ignored.
    msg = _selu(jnp.dot(h, w2_ref[...],
                        preferred_element_type=jnp.float32) + mb2)     # [t, f]

    # Node -> graph one-hot built in-kernel from int32 ids (no [N,G] HBM).
    g_iota = lax.broadcasted_iota(jnp.int32, (t, gp), 1)
    m_bool = bid_ref[...] == g_iota                                    # [t, gp]
    m_f32 = m_bool.astype(jnp.float32)

    # Online softmax: raise the running per-graph max, rescale accumulators.
    tile_max = jnp.max(jnp.where(m_bool, gate, _NEG_BIG),
                       axis=0, keepdims=True)                          # [1, gp]
    new_max = jnp.maximum(segmax_ref[...], tile_max)
    rescale = jnp.exp(segmax_ref[...] - new_max)                       # [1, gp]
    segmax_ref[...] = new_max

    # Gather this node's graph max (exact: one-hot select + lane reduce).
    node_max = jnp.sum(jnp.where(m_bool, new_max, 0.0),
                       axis=1, keepdims=True)                          # [t, 1]
    e = jnp.exp(gate - node_max)                                       # [t, 1]

    segsum_ref[...] = segsum_ref[...] * rescale + jnp.sum(
        jnp.where(m_bool, e, 0.0), axis=0, keepdims=True)              # [1, gp]
    # Scatter-add e*msg into the per-graph context: contract over the node
    # axis.  ctx is stored [f, gp] so `rescale` broadcasts over sublanes.
    ctx_ref[...] = ctx_ref[...] * rescale + lax.dot_general(
        e * msg, m_f32, (((0,), (0,)), ((), ())),
        preferred_element_type=jnp.float32)                            # [f, gp]


# ---------------------------------------------------------------------------
# Kernel B: normalize, broadcast back to nodes, residual + LayerNorm.
# Node tiles are independent -> "parallel" grid axis (megacore on v7x).
# ---------------------------------------------------------------------------
def _norm_kernel(x_ref, bid_ref, segsum_ref, ctx_ref, v_ref, out_ref, *, f, eps):
    t = x_ref.shape[0]
    gp = segsum_ref.shape[1]

    xf = x_ref[...].astype(jnp.float32)                                # [t, f]
    gamma = v_ref[3:4, 0:f]
    beta = v_ref[4:5, 0:f]

    g_iota = lax.broadcasted_iota(jnp.int32, (t, gp), 1)
    m_bool = bid_ref[...] == g_iota                                    # [t, gp]
    m_f32 = m_bool.astype(jnp.float32)

    # Per-node gather of this graph's exp-sum and context row.
    node_sum = jnp.sum(jnp.where(m_bool, segsum_ref[...], 0.0),
                       axis=1, keepdims=True)                          # [t, 1]
    node_ctx = lax.dot_general(m_f32, ctx_ref[...],
                               (((1,), (1,)), ((), ())),
                               preferred_element_type=jnp.float32)     # [t, f]
    node_ctx = node_ctx / node_sum     # exact division (approx recip dropped)

    upd = xf + node_ctx
    mean = jnp.sum(upd, axis=-1, keepdims=True) * (1.0 / f)
    cent = upd - mean
    var = jnp.sum(cent * cent, axis=-1, keepdims=True) * (1.0 / f)
    out_ref[...] = (cent * lax.rsqrt(var + eps) * gamma + beta).astype(out_ref.dtype)


@functools.partial(jax.jit, static_argnames=("num_graphs", "node_tile"))
def message_layer(elem_weights, elem_in_fea, batch, params, *, num_graphs,
                  node_tile=2048):
    """Pallas implementation of MessageLayerTorch.forward."""
    del elem_weights  # unused, matches the reference module
    assert node_tile % SUB == 0

    n, f = elem_in_fea.shape
    hg = params["gate_w1"].shape[1]
    hm = params["msg_w1"].shape[1]
    kh = hg + hm
    vw = max(f, kh)                          # lane width of the row-vector slab
    gp = _round_up(num_graphs + 1, LANE)     # +1: dummy graph for padded rows

    t = min(node_tile, _round_up(n, SUB))    # node tile (sublane-aligned)
    n_pad = _round_up(n, t)
    n_tiles = n_pad // t

    x = elem_in_fea.astype(jnp.float32)
    if n_pad != n:
        x = jnp.zeros((n_pad, f), jnp.float32).at[:n].set(x)
    # Padded nodes map to the dummy graph id `num_graphs` (never read back).
    bid = jnp.full((n_pad, 1), num_graphs, jnp.int32).at[:n, 0].set(
        batch.astype(jnp.int32))

    # ---- pack the 10 parameter tensors into 3 small resident slabs ----
    # w1_slab [f, kh]: cols 0:hg = gate_w1, cols hg:kh = msg_w1.
    w1_slab = jnp.zeros((f, kh), jnp.float32)
    w1_slab = w1_slab.at[:, 0:hg].set(params["gate_w1"])
    w1_slab = w1_slab.at[:, hg:kh].set(params["msg_w1"])
    # w2_slab [kh, f]: rows hg:kh = msg_w2 (rows 0:hg zero -> gate hidden ignored).
    w2_slab = jnp.zeros((kh, f), jnp.float32)
    w2_slab = w2_slab.at[hg:kh, :].set(params["msg_w2"])
    # v_slab [8, vw]: row 0 = gate_b1|msg_b1, 1 = gate_w2 row, 2 = msg_b2,
    #                 3 = ln_gamma, 4 = ln_beta, 5 = gate_b2 scalar.
    v_slab = jnp.zeros((8, vw), jnp.float32)
    v_slab = v_slab.at[0, 0:hg].set(params["gate_b1"].reshape(-1))
    v_slab = v_slab.at[0, hg:kh].set(params["msg_b1"].reshape(-1))
    v_slab = v_slab.at[1, 0:hg].set(params["gate_w2"].reshape(-1))
    v_slab = v_slab.at[2, 0:f].set(params["msg_b2"].reshape(-1))
    v_slab = v_slab.at[3, 0:f].set(params["ln_gamma"].reshape(-1))
    v_slab = v_slab.at[4, 0:f].set(params["ln_beta"].reshape(-1))
    v_slab = v_slab.at[5, 0].set(params["gate_b2"].reshape(()))

    # ---- pass 1: online segment softmax -> per-graph exp-sum + raw context ----
    # (Possible further tuning: pipeline_mode=pl.Buffered(3) on the streamed
    #  x / bid specs — sweep on hardware; expected single-digit % at most.)
    segsum, ctx = pl.pallas_call(
        functools.partial(_accum_kernel, f=f, kh=kh),
        out_shape=(jax.ShapeDtypeStruct((1, gp), jnp.float32),
                   jax.ShapeDtypeStruct((f, gp), jnp.float32)),
        grid_spec=pltpu.PrefetchScalarGridSpec(
            num_scalar_prefetch=0,
            grid=(n_tiles,),
            in_specs=[
                pl.BlockSpec((t, f), lambda i: (i, 0)),      # x tile (streams, true F)
                pl.BlockSpec((t, 1), lambda i: (i, 0)),      # graph ids (streams)
                pl.BlockSpec((f, kh), lambda i: (0, 0)),     # gate_w1|msg_w1 (resident)
                pl.BlockSpec((kh, f), lambda i: (0, 0)),     # msg_w2 (resident)
                pl.BlockSpec((8, vw), lambda i: (0, 0)),     # row-vector slab (resident)
            ],
            out_specs=(
                pl.BlockSpec((1, gp), lambda i: (0, 0)),     # resident accumulator
                pl.BlockSpec((f, gp), lambda i: (0, 0)),     # resident accumulator
            ),
            scratch_shapes=[pltpu.VMEM((1, gp), jnp.float32)],  # running per-graph max
        ),
        compiler_params=pltpu.CompilerParams(
            # Per-graph accumulators are shared across node tiles -> sequential.
            dimension_semantics=("arbitrary",),
            vmem_limit_bytes=_VMEM_LIMIT,
        ),
    )(x, bid, w1_slab, w2_slab, v_slab)

    # ---- pass 2: normalize + broadcast + residual + LayerNorm (only output) ----
    out_pad = pl.pallas_call(
        functools.partial(_norm_kernel, f=f, eps=LN_EPS),
        out_shape=jax.ShapeDtypeStruct((n_pad, f), elem_in_fea.dtype),
        grid_spec=pltpu.PrefetchScalarGridSpec(
            num_scalar_prefetch=0,
            grid=(n_tiles,),
            in_specs=[
                pl.BlockSpec((t, f), lambda i: (i, 0)),      # x tile (streams)
                pl.BlockSpec((t, 1), lambda i: (i, 0)),      # graph ids (streams)
                pl.BlockSpec((1, gp), lambda i: (0, 0)),     # segsum (resident)
                pl.BlockSpec((f, gp), lambda i: (0, 0)),     # ctx (resident)
                pl.BlockSpec((8, vw), lambda i: (0, 0)),     # gamma/beta slab
            ],
            out_specs=pl.BlockSpec((t, f), lambda i: (i, 0)),
        ),
        compiler_params=pltpu.CompilerParams(
            # No cross-tile dependency here -> megacore-parallel on v7x.
            dimension_semantics=("parallel",),
            vmem_limit_bytes=_VMEM_LIMIT,
        ),
    )(x, bid, segsum, ctx, v_slab)

    out = out_pad[:n] if n_pad != n else out_pad
    return out.astype(elem_in_fea.dtype)


def init_params(key, elem_fea_len, gate_hidden, msg_hidden):
    ks = jax.random.split(key, 8)
    s = 0.1
    return {
        "gate_w1": s * jax.random.normal(ks[0], (elem_fea_len, gate_hidden), jnp.float32),
        "gate_b1": s * jax.random.normal(ks[1], (1, gate_hidden), jnp.float32),
        "gate_w2": s * jax.random.normal(ks[2], (gate_hidden, 1), jnp.float32),
        "gate_b2": s * jax.random.normal(ks[3], (1, 1), jnp.float32),
        "msg_w1": s * jax.random.normal(ks[4], (elem_fea_len, msg_hidden), jnp.float32),
        "msg_b1": s * jax.random.normal(ks[5], (1, msg_hidden), jnp.float32),
        "msg_w2": s * jax.random.normal(ks[6], (msg_hidden, elem_fea_len), jnp.float32),
        "msg_b2": s * jax.random.normal(ks[7], (1, elem_fea_len), jnp.float32),
        "ln_gamma": jnp.ones((1, elem_fea_len), jnp.float32),
        "ln_beta": jnp.zeros((1, elem_fea_len), jnp.float32),
    }


def _reference(elem_in_fea, batch, params, num_graphs):
    """Pure-JAX reference (segment ops with explicit gather) for cross-check."""
    x = elem_in_fea.astype(jnp.float32)
    selu = jax.nn.selu
    h = selu(x @ params["gate_w1"] + params["gate_b1"])
    gate = h @ params["gate_w2"] + params["gate_b2"]                       # [N,1]
    hm = selu(x @ params["msg_w1"] + params["msg_b1"])
    msg = selu(hm @ params["msg_w2"] + params["msg_b2"])                   # [N,F]
    seg_max = jax.ops.segment_max(gate[:, 0], batch, num_segments=num_graphs)
    e = jnp.exp(gate[:, 0] - seg_max[batch])
    seg_sum = jax.ops.segment_sum(e, batch, num_segments=num_graphs)
    attn = (e / seg_sum[batch])[:, None]
    ctx = jax.ops.segment_sum(attn * msg, batch, num_segments=num_graphs)  # [G,F]
    upd = x + ctx[batch]
    mean = upd.mean(-1, keepdims=True)
    var = ((upd - mean) ** 2).mean(-1, keepdims=True)
    return (upd - mean) * jax.lax.rsqrt(var + LN_EPS) * params["ln_gamma"] + params["ln_beta"]


if __name__ == "__main__":
    key = jax.random.PRNGKey(0)
    k_param, k_x, k_w, k_x2 = jax.random.split(key, 4)

    params = init_params(k_param, ELEM_FEA_LEN, GATE_HIDDEN, MSG_HIDDEN)

    # Tolerance note: the attention normalization is now exact division; the
    # remaining tolerance only covers default MXU matmul-precision differences
    # between the Pallas kernel and the XLA reference.
    TOL = 2e-3

    # --- Test 1: module-sized shapes (single node tile, 2 graphs) ---
    elem_in_fea = jax.random.normal(k_x, (N_NODES, ELEM_FEA_LEN), jnp.float32)
    elem_weights = jax.random.uniform(k_w, (N_NODES, 1), jnp.float32)  # unused by forward
    batch = jnp.concatenate([
        jnp.zeros((N_NODES // 2,), jnp.int32),
        jnp.ones((N_NODES - N_NODES // 2,), jnp.int32),
    ])
    out = message_layer(elem_weights, elem_in_fea, batch, params, num_graphs=N_GRAPHS)
    out = jax.block_until_ready(out)
    ref = _reference(elem_in_fea, batch, params, N_GRAPHS)
    np.testing.assert_allclose(np.asarray(out), np.asarray(ref), rtol=TOL, atol=TOL)

    # --- Test 2: multi-tile grid + node padding + 3 graphs (exercises the
    #     cross-tile online-softmax rescale and the dummy pad-graph path) ---
    n2, g2 = 45, 3
    x2 = jax.random.normal(k_x2, (n2, ELEM_FEA_LEN), jnp.float32)
    w2 = jnp.ones((n2, 1), jnp.float32)
    batch2 = jnp.concatenate([jnp.full((s,), i, jnp.int32)
                              for i, s in enumerate((20, 15, 10))])
    out2 = message_layer(w2, x2, batch2, params, num_graphs=g2, node_tile=16)
    out2 = jax.block_until_ready(out2)
    ref2 = _reference(x2, batch2, params, g2)
    np.testing.assert_allclose(np.asarray(out2), np.asarray(ref2), rtol=TOL, atol=TOL)

    print("KERNEL_OK")
</pallas_src>

<mosaic_0001>
module attributes {stable_mosaic.version = 11 : i64} {
  func.func @_norm_kernel(%arg0: i32, %arg1: memref<16x32xf32, #tpu.memory_space<vmem>>, %arg2: memref<16x1xi32, #tpu.memory_space<vmem>>, %arg3: memref<1x128xf32, #tpu.memory_space<vmem>>, %arg4: memref<32x128xf32, #tpu.memory_space<vmem>>, %arg5: memref<8x32xf32, #tpu.memory_space<vmem>>, %arg6: memref<16x32xf32, #tpu.memory_space<vmem>>) attributes {dimension_semantics = [#tpu.dimension_semantics<parallel>], iteration_bounds = array<i64: 1>, scalar_prefetch = 0 : i64, scratch_operands = 0 : i64, tpu.core_type = #tpu.core_type<tc>, window_params = [{transform_indices = @transform_0, window_bounds = array<i64: 16, 32>}, {transform_indices = @transform_1, window_bounds = array<i64: 16, 1>}, {pipeline_mode = #tpu.pipeline_mode<synchronous>, transform_indices = @transform_2, window_bounds = array<i64: 1, 128>}, {pipeline_mode = #tpu.pipeline_mode<synchronous>, transform_indices = @transform_3, window_bounds = array<i64: 32, 128>}, {pipeline_mode = #tpu.pipeline_mode<synchronous>, transform_indices = @transform_4, window_bounds = array<i64: 8, 32>}, {transform_indices = @transform_5, window_bounds = array<i64: 16, 32>}]} {
    %c0 = arith.constant 0 : index
    %c0_0 = arith.constant 0 : index
    %0 = vector.load %arg1[%c0, %c0_0] : memref<16x32xf32, #tpu.memory_space<vmem>>, vector<16x32xf32>
    %c3 = arith.constant 3 : index
    %c0_1 = arith.constant 0 : index
    %1 = vector.load %arg5[%c3, %c0_1] : memref<8x32xf32, #tpu.memory_space<vmem>>, vector<1x32xf32>
    %c4 = arith.constant 4 : index
    %c0_2 = arith.constant 0 : index
    %2 = vector.load %arg5[%c4, %c0_2] : memref<8x32xf32, #tpu.memory_space<vmem>>, vector<1x32xf32>
    %3 = tpu.iota {dimensions = array<i32: 1>} : vector<16x128xi32>
    %c0_3 = arith.constant 0 : index
    %c0_4 = arith.constant 0 : index
    %4 = vector.load %arg2[%c0_3, %c0_4] : memref<16x1xi32, #tpu.memory_space<vmem>>, vector<16x1xi32>
    %5 = vector.broadcast %4 : vector<16x1xi32> to vector<16x128xi32>
    %6 = arith.cmpi eq, %5, %3 : vector<16x128xi32>
    %7 = arith.extui %6 : vector<16x128xi1> to vector<16x128xi32>
    %8 = arith.sitofp %7 : vector<16x128xi32> to vector<16x128xf32>
    %c0_5 = arith.constant 0 : index
    %c0_6 = arith.constant 0 : index
    %9 = vector.load %arg3[%c0_5, %c0_6] : memref<1x128xf32, #tpu.memory_space<vmem>>, vector<1x128xf32>
    %cst = arith.constant 0.000000e+00 : f32
    %10 = vector.shape_cast %9 : vector<1x128xf32> to vector<1x128xf32>
    %11 = vector.broadcast %10 : vector<1x128xf32> to vector<16x128xf32>
    %12 = vector.broadcast %cst : f32 to vector<16x128xf32>
    %13 = arith.select %6, %11, %12 : vector<16x128xi1>, vector<16x128xf32>
    %cst_7 = arith.constant dense<0.000000e+00> : vector<16xf32>
    %14 = vector.multi_reduction <add>, %13, %cst_7 [1] : vector<16x128xf32> to vector<16xf32>
    %15 = vector.shape_cast %14 : vector<16xf32> to vector<16x1xf32>
    %c0_8 = arith.constant 0 : index
    %c0_9 = arith.constant 0 : index
    %16 = vector.load %arg4[%c0_8, %c0_9] : memref<32x128xf32, #tpu.memory_space<vmem>>, vector<32x128xf32>
    %cst_10 = arith.constant dense<0.000000e+00> : vector<16x32xf32>
    %17 = tpu.matmul %8, %16, %cst_10 {dimension_numbers = #tpu.dot_dimension_numbers<[1], [1], [0], [0], [0, 0, 1, 0], [], []>} : vector<16x128xf32>, vector<32x128xf32>, vector<16x32xf32> -> vector<16x32xf32>
    %18 = vector.broadcast %15 : vector<16x1xf32> to vector<16x32xf32>
    %19 = arith.divf %17, %18 : vector<16x32xf32>
    %20 = arith.addf %0, %19 : vector<16x32xf32>
    %cst_11 = arith.constant dense<0.000000e+00> : vector<16xf32>
    %21 = vector.multi_reduction <add>, %20, %cst_11 [1] : vector<16x32xf32> to vector<16xf32>
    %22 = vector.shape_cast %21 : vector<16xf32> to vector<16x1xf32>
    %cst_12 = arith.constant 3.125000e-02 : f32
    %23 = vector.broadcast %cst_12 : f32 to vector<16x1xf32>
    %24 = arith.mulf %22, %23 : vector<16x1xf32>
    %25 = vector.broadcast %24 : vector<16x1xf32> to vector<16x32xf32>
    %26 = arith.subf %20, %25 : vector<16x32xf32>
    %27 = arith.mulf %26, %26 : vector<16x32xf32>
    %cst_13 = arith.constant dense<0.000000e+00> : vector<16xf32>
    %28 = vector.multi_reduction <add>, %27, %cst_13 [1] : vector<16x32xf32> to vector<16xf32>
    %29 = vector.shape_cast %28 : vector<16xf32> to vector<16x1xf32>
    %cst_14 = arith.constant 3.125000e-02 : f32
    %30 = vector.broadcast %cst_14 : f32 to vector<16x1xf32>
    %31 = arith.mulf %29, %30 : vector<16x1xf32>
    %cst_15 = arith.constant 9.99999974E-6 : f32
    %32 = vector.broadcast %cst_15 : f32 to vector<16x1xf32>
    %33 = arith.addf %31, %32 : vector<16x1xf32>
    %34 = math.rsqrt %33 : vector<16x1xf32>
    %35 = vector.broadcast %34 : vector<16x1xf32> to vector<16x32xf32>
    %36 = arith.mulf %26, %35 : vector<16x32xf32>
    %37 = vector.broadcast %1 : vector<1x32xf32> to vector<16x32xf32>
    %38 = arith.mulf %36, %37 : vector<16x32xf32>
    %39 = vector.broadcast %2 : vector<1x32xf32> to vector<16x32xf32>
    %40 = arith.addf %38, %39 : vector<16x32xf32>
    %c0_16 = arith.constant 0 : index
    %c0_17 = arith.constant 0 : index
    %41 = vector.load %arg6[%c0_16, %c0_17] : memref<16x32xf32, #tpu.memory_space<vmem>>, vector<16x32xf32>
    tpu.vector_store %arg6[%c0_16, %c0_17], %40 {strides = array<i32>} : memref<16x32xf32, #tpu.memory_space<vmem>>, vector<16x32xf32>,
    return
  }
  func.func @transform_0(%arg0: i32) -> (i32, i32) {
    %c0_i32 = arith.constant 0 : i32
    %c0_i32_0 = arith.constant 0 : i32
    return %arg0, %c0_i32 : i32, i32
  }
  func.func @transform_1(%arg0: i32) -> (i32, i32) {
    %c0_i32 = arith.constant 0 : i32
    %c0_i32_0 = arith.constant 0 : i32
    return %arg0, %c0_i32 : i32, i32
  }
  func.func @transform_2(%arg0: i32) -> (i32, i32) {
    %c0_i32 = arith.constant 0 : i32
    %c0_i32_0 = arith.constant 0 : i32
    %c0_i32_1 = arith.constant 0 : i32
    return %c0_i32, %c0_i32_0 : i32, i32
  }
  func.func @transform_3(%arg0: i32) -> (i32, i32) {
    %c0_i32 = arith.constant 0 : i32
    %c0_i32_0 = arith.constant 0 : i32
    %c0_i32_1 = arith.constant 0 : i32
    return %c0_i32, %c0_i32_0 : i32, i32
  }
  func.func @transform_4(%arg0: i32) -> (i32, i32) {
    %c0_i32 = arith.constant 0 : i32
    %c0_i32_0 = arith.constant 0 : i32
    %c0_i32_1 = arith.constant 0 : i32
    return %c0_i32, %c0_i32_0 : i32, i32
  }
  func.func @transform_5(%arg0: i32) -> (i32, i32) {
    %c0_i32 = arith.constant 0 : i32
    %c0_i32_0 = arith.constant 0 : i32
    return %arg0, %c0_i32 : i32, i32
  }
}

module attributes {stable_mosaic.version = 11 : i64} {
  func.func @_accum_kernel(%arg0: i32, %arg1: memref<16x32xf32, #tpu.memory_space<vmem>>, %arg2: memref<16x1xi32, #tpu.memory_space<vmem>>, %arg3: memref<32x32xf32, #tpu.memory_space<vmem>>, %arg4: memref<32x32xf32, #tpu.memory_space<vmem>>, %arg5: memref<8x32xf32, #tpu.memory_space<vmem>>, %arg6: memref<1x128xf32, #tpu.memory_space<vmem>>, %arg7: memref<32x128xf32, #tpu.memory_space<vmem>>, %arg8: memref<1x128xf32, #tpu.memory_space<vmem>>) attributes {dimension_semantics = [#tpu.dimension_semantics<arbitrary>], iteration_bounds = array<i64: 1>, scalar_prefetch = 0 : i64, scratch_operands = 1 : i64, tpu.core_type = #tpu.core_type<tc>, window_params = [{transform_indices = @transform_0, window_bounds = array<i64: 16, 32>}, {transform_indices = @transform_1, window_bounds = array<i64: 16, 1>}, {pipeline_mode = #tpu.pipeline_mode<synchronous>, transform_indices = @transform_2, window_bounds = array<i64: 32, 32>}, {pipeline_mode = #tpu.pipeline_mode<synchronous>, transform_indices = @transform_3, window_bounds = array<i64: 32, 32>}, {pipeline_mode = #tpu.pipeline_mode<synchronous>, transform_indices = @transform_4, window_bounds = array<i64: 8, 32>}, {pipeline_mode = #tpu.pipeline_mode<synchronous>, transform_indices = @transform_5, window_bounds = array<i64: 1, 128>}, {pipeline_mode = #tpu.pipeline_mode<synchronous>, transform_indices = @transform_6, window_bounds = array<i64: 32, 128>}]} {
    %c0_i32 = arith.constant 0 : i32
    %0 = arith.cmpi eq, %arg0, %c0_i32 : i32
    %1 = arith.extui %0 : i1 to i32
    %c0_i32_0 = arith.constant 0 : i32
    %2 = arith.cmpi ne, %1, %c0_i32_0 : i32
    scf.if %2 {
      %cst_44 = arith.constant -1.000000e+30 : f32
      %86 = vector.broadcast %cst_44 : f32 to vector<1x128xf32>
      %c0_45 = arith.constant 0 : index
      %c0_46 = arith.constant 0 : index
      %87 = vector.load %arg8[%c0_45, %c0_46] : memref<1x128xf32, #tpu.memory_space<vmem>>, vector<1x128xf32>
      tpu.vector_store %arg8[%c0_45, %c0_46], %86 {strides = array<i32>} : memref<1x128xf32, #tpu.memory_space<vmem>>, vector<1x128xf32>,
      %cst_47 = arith.constant 0.000000e+00 : f32
      %88 = vector.broadcast %cst_47 : f32 to vector<1x128xf32>
      %c0_48 = arith.constant 0 : index
      %c0_49 = arith.constant 0 : index
      %89 = vector.load %arg6[%c0_48, %c0_49] : memref<1x128xf32, #tpu.memory_space<vmem>>, vector<1x128xf32>
      tpu.vector_store %arg6[%c0_48, %c0_49], %88 {strides = array<i32>} : memref<1x128xf32, #tpu.memory_space<vmem>>, vector<1x128xf32>,
      %cst_50 = arith.constant 0.000000e+00 : f32
      %90 = vector.broadcast %cst_50 : f32 to vector<32x128xf32>
      %c0_51 = arith.constant 0 : index
      %c0_52 = arith.constant 0 : index
      %91 = vector.load %arg7[%c0_51, %c0_52] : memref<32x128xf32, #tpu.memory_space<vmem>>, vector<32x128xf32>
      tpu.vector_store %arg7[%c0_51, %c0_52], %90 {strides = array<i32>} : memref<32x128xf32, #tpu.memory_space<vmem>>, vector<32x128xf32>,
    } else {
    }
    %c0 = arith.constant 0 : index
    %c0_1 = arith.constant 0 : index
    %3 = vector.load %arg1[%c0, %c0_1] : memref<16x32xf32, #tpu.memory_space<vmem>>, vector<16x32xf32>
    %c0_2 = arith.constant 0 : index
    %c0_3 = arith.constant 0 : index
    %4 = vector.load %arg5[%c0_2, %c0_3] : memref<8x32xf32, #tpu.memory_space<vmem>>, vector<1x32xf32>
    %c1 = arith.constant 1 : index
    %c0_4 = arith.constant 0 : index
    %5 = vector.load %arg5[%c1, %c0_4] : memref<8x32xf32, #tpu.memory_space<vmem>>, vector<1x32xf32>
    %c2 = arith.constant 2 : index
    %c0_5 = arith.constant 0 : index
    %6 = vector.load %arg5[%c2, %c0_5] : memref<8x32xf32, #tpu.memory_space<vmem>>, vector<1x32xf32>
    %c5 = arith.constant 5 : index
    %c0_6 = arith.constant 0 : index
    %7 = vector.load %arg5[%c5, %c0_6] : memref<8x32xf32, #tpu.memory_space<vmem>>, vector<1x1xf32>
    %c0_7 = arith.constant 0 : index
    %c0_8 = arith.constant 0 : index
    %8 = vector.load %arg3[%c0_7, %c0_8] : memref<32x32xf32, #tpu.memory_space<vmem>>, vector<32x32xf32>
    %cst = arith.constant dense<0.000000e+00> : vector<16x32xf32>
    %9 = tpu.matmul %3, %8, %cst {dimension_numbers = #tpu.dot_dimension_numbers<[1], [0], [0], [1], [0, 0, 1, 1], [], []>} : vector<16x32xf32>, vector<32x32xf32>, vector<16x32xf32> -> vector<16x32xf32>
    %10 = vector.broadcast %4 : vector<1x32xf32> to vector<16x32xf32>
    %11 = arith.addf %9, %10 : vector<16x32xf32>
    %cst_9 = arith.constant 0.000000e+00 : f32
    %12 = vector.broadcast %cst_9 : f32 to vector<16x32xf32>
    %13 = arith.cmpf ogt, %11, %12 : vector<16x32xf32>
    %14 = math.exp %11 : vector<16x32xf32>
    %cst_10 = arith.constant 1.000000e+00 : f32
    %15 = vector.broadcast %cst_10 : f32 to vector<16x32xf32>
    %16 = arith.subf %14, %15 : vector<16x32xf32>
    %cst_11 = arith.constant 1.67326319 : f32
    %17 = vector.broadcast %cst_11 : f32 to vector<16x32xf32>
    %18 = arith.mulf %17, %16 : vector<16x32xf32>
    %19 = arith.select %13, %11, %18 : vector<16x32xi1>, vector<16x32xf32>
    %cst_12 = arith.constant 1.05070102 : f32
    %20 = vector.broadcast %cst_12 : f32 to vector<16x32xf32>
    %21 = arith.mulf %20, %19 : vector<16x32xf32>
    %22 = vector.broadcast %5 : vector<1x32xf32> to vector<16x32xf32>
    %23 = arith.mulf %21, %22 : vector<16x32xf32>
    %cst_13 = arith.constant dense<0.000000e+00> : vector<16xf32>
    %24 = vector.multi_reduction <add>, %23, %cst_13 [1] : vector<16x32xf32> to vector<16xf32>
    %25 = vector.shape_cast %24 : vector<16xf32> to vector<16x1xf32>
    %26 = vector.broadcast %7 : vector<1x1xf32> to vector<16x1xf32>
    %27 = arith.addf %25, %26 : vector<16x1xf32>
    %c0_14 = arith.constant 0 : index
    %c0_15 = arith.constant 0 : index
    %28 = vector.load %arg4[%c0_14, %c0_15] : memref<32x32xf32, #tpu.memory_space<vmem>>, vector<32x32xf32>
    %cst_16 = arith.constant dense<0.000000e+00> : vector<16x32xf32>
    %29 = tpu.matmul %21, %28, %cst_16 {dimension_numbers = #tpu.dot_dimension_numbers<[1], [0], [0], [1], [0, 0, 1, 1], [], []>} : vector<16x32xf32>, vector<32x32xf32>, vector<16x32xf32> -> vector<16x32xf32>
    %30 = vector.broadcast %6 : vector<1x32xf32> to vector<16x32xf32>
    %31 = arith.addf %29, %30 : vector<16x32xf32>
    %cst_17 = arith.constant 0.000000e+00 : f32
    %32 = vector.broadcast %cst_17 : f32 to vector<16x32xf32>
    %33 = arith.cmpf ogt, %31, %32 : vector<16x32xf32>
    %34 = math.exp %31 : vector<16x32xf32>
    %cst_18 = arith.constant 1.000000e+00 : f32
    %35 = vector.broadcast %cst_18 : f32 to vector<16x32xf32>
    %36 = arith.subf %34, %35 : vector<16x32xf32>
    %cst_19 = arith.constant 1.67326319 : f32
    %37 = vector.broadcast %cst_19 : f32 to vector<16x32xf32>
    %38 = arith.mulf %37, %36 : vector<16x32xf32>
    %39 = arith.select %33, %31, %38 : vector<16x32xi1>, vector<16x32xf32>
    %cst_20 = arith.constant 1.05070102 : f32
    %40 = vector.broadcast %cst_20 : f32 to vector<16x32xf32>
    %41 = arith.mulf %40, %39 : vector<16x32xf32>
    %42 = tpu.iota {dimensions = array<i32: 1>} : vector<16x128xi32>
    %c0_21 = arith.constant 0 : index
    %c0_22 = arith.constant 0 : index
    %43 = vector.load %arg2[%c0_21, %c0_22] : memref<16x1xi32, #tpu.memory_space<vmem>>, vector<16x1xi32>
    %44 = vector.broadcast %43 : vector<16x1xi32> to vector<16x128xi32>
    %45 = arith.cmpi eq, %44, %42 : vector<16x128xi32>
    %46 = arith.extui %45 : vector<16x128xi1> to vector<16x128xi32>
    %47 = arith.sitofp %46 : vector<16x128xi32> to vector<16x128xf32>
    %cst_23 = arith.constant -1.000000e+30 : f32
    %48 = vector.shape_cast %27 : vector<16x1xf32> to vector<16x1xf32>
    %49 = vector.broadcast %48 : vector<16x1xf32> to vector<16x128xf32>
    %50 = vector.broadcast %cst_23 : f32 to vector<16x128xf32>
    %51 = arith.select %45, %49, %50 : vector<16x128xi1>, vector<16x128xf32>
    %cst_24 = arith.constant dense<0xFF800000> : vector<128xf32>
    %52 = vector.multi_reduction <maximumf>, %51, %cst_24 [0] : vector<16x128xf32> to vector<128xf32>
    %53 = vector.shape_cast %52 : vector<128xf32> to vector<1x128xf32>
    %c0_25 = arith.constant 0 : index
    %c0_26 = arith.constant 0 : index
    %54 = vector.load %arg8[%c0_25, %c0_26] : memref<1x128xf32, #tpu.memory_space<vmem>>, vector<1x128xf32>
    %55 = arith.maximumf %54, %53 : vector<1x128xf32>
    %c0_27 = arith.constant 0 : index
    %c0_28 = arith.constant 0 : index
    %56 = vector.load %arg8[%c0_27, %c0_28] : memref<1x128xf32, #tpu.memory_space<vmem>>, vector<1x128xf32>
    %57 = arith.subf %56, %55 : vector<1x128xf32>
    %58 = math.exp %57 : vector<1x128xf32>
    %c0_29 = arith.constant 0 : index
    %c0_30 = arith.constant 0 : index
    %59 = vector.load %arg8[%c0_29, %c0_30] : memref<1x128xf32, #tpu.memory_space<vmem>>, vector<1x128xf32>
    tpu.vector_store %arg8[%c0_29, %c0_30], %55 {strides = array<i32>} : memref<1x128xf32, #tpu.memory_space<vmem>>, vector<1x128xf32>,
    %cst_31 = arith.constant 0.000000e+00 : f32
    %60 = vector.shape_cast %55 : vector<1x128xf32> to vector<1x128xf32>
    %61 = vector.broadcast %60 : vector<1x128xf32> to vector<16x128xf32>
    %62 = vector.broadcast %cst_31 : f32 to vector<16x128xf32>
    %63 = arith.select %45, %61, %62 : vector<16x128xi1>, vector<16x128xf32>
    %cst_32 = arith.constant dense<0.000000e+00> : vector<16xf32>
    %64 = vector.multi_reduction <add>, %63, %cst_32 [1] : vector<16x128xf32> to vector<16xf32>
    %65 = vector.shape_cast %64 : vector<16xf32> to vector<16x1xf32>
    %66 = arith.subf %27, %65 : vector<16x1xf32>
    %67 = math.exp %66 : vector<16x1xf32>
    %c0_33 = arith.constant 0 : index
    %c0_34 = arith.constant 0 : index
    %68 = vector.load %arg6[%c0_33, %c0_34] : memref<1x128xf32, #tpu.memory_space<vmem>>, vector<1x128xf32>
    %69 = arith.mulf %68, %58 : vector<1x128xf32>
    %cst_35 = arith.constant 0.000000e+00 : f32
    %70 = vector.shape_cast %67 : vector<16x1xf32> to vector<16x1xf32>
    %71 = vector.broadcast %70 : vector<16x1xf32> to vector<16x128xf32>
    %72 = vector.broadcast %cst_35 : f32 to vector<16x128xf32>
    %73 = arith.select %45, %71, %72 : vector<16x128xi1>, vector<16x128xf32>
    %cst_36 = arith.constant dense<0.000000e+00> : vector<128xf32>
    %74 = vector.multi_reduction <add>, %73, %cst_36 [0] : vector<16x128xf32> to vector<128xf32>
    %75 = vector.shape_cast %74 : vector<128xf32> to vector<1x128xf32>
    %76 = arith.addf %69, %75 : vector<1x128xf32>
    %c0_37 = arith.constant 0 : index
    %c0_38 = arith.constant 0 : index
    %77 = vector.load %arg6[%c0_37, %c0_38] : memref<1x128xf32, #tpu.memory_space<vmem>>, vector<1x128xf32>
    tpu.vector_store %arg6[%c0_37, %c0_38], %76 {strides = array<i32>} : memref<1x128xf32, #tpu.memory_space<vmem>>, vector<1x128xf32>,
    %c0_39 = arith.constant 0 : index
    %c0_40 = arith.constant 0 : index
    %78 = vector.load %arg7[%c0_39, %c0_40] : memref<32x128xf32, #tpu.memory_space<vmem>>, vector<32x128xf32>
    %79 = vector.broadcast %58 : vector<1x128xf32> to vector<32x128xf32>
    %80 = arith.mulf %78, %79 : vector<32x128xf32>
    %81 = vector.broadcast %67 : vector<16x1xf32> to vector<16x32xf32>
    %82 = arith.mulf %81, %41 : vector<16x32xf32>
    %cst_41 = arith.constant dense<0.000000e+00> : vector<32x128xf32>
    %83 = tpu.matmul %82, %47, %cst_41 {dimension_numbers = #tpu.dot_dimension_numbers<[0], [0], [1], [1], [0, 1, 1, 1], [], []>} : vector<16x32xf32>, vector<16x128xf32>, vector<32x128xf32> -> vector<32x128xf32>
    %84 = arith.addf %80, %83 : vector<32x128xf32>
    %c0_42 = arith.constant 0 : index
    %c0_43 = arith.constant 0 : index
    %85 = vector.load %arg7[%c0_42, %c0_43] : memref<32x128xf32, #tpu.memory_space<vmem>>, vector<32x128xf32>
    tpu.vector_store %arg7[%c0_42, %c0_43], %84 {strides = array<i32>} : memref<32x128xf32, #tpu.memory_space<vmem>>, vector<32x128xf32>,
    return
  }
  func.func @transform_0(%arg0: i32) -> (i32, i32) {
    %c0_i32 = arith.constant 0 : i32
    %c0_i32_0 = arith.constant 0 : i32
    return %arg0, %c0_i32 : i32, i32
  }
  func.func @transform_1(%arg0: i32) -> (i32, i32) {
    %c0_i32 = arith.constant 0 : i32
    %c0_i32_0 = arith.constant 0 : i32
    return %arg0, %c0_i32 : i32, i32
  }
  func.func @transform_2(%arg0: i32) -> (i32, i32) {
    %c0_i32 = arith.constant 0 : i32
    %c0_i32_0 = arith.constant 0 : i32
    %c0_i32_1 = arith.constant 0 : i32
    return %c0_i32, %c0_i32_0 : i32, i32
  }
  func.func @transform_3(%arg0: i32) -> (i32, i32) {
    %c0_i32 = arith.constant 0 : i32
    %c0_i32_0 = arith.constant 0 : i32
    %c0_i32_1 = arith.constant 0 : i32
    return %c0_i32, %c0_i32_0 : i32, i32
  }
  func.func @transform_4(%arg0: i32) -> (i32, i32) {
    %c0_i32 = arith.constant 0 : i32
    %c0_i32_0 = arith.constant 0 : i32
    %c0_i32_1 = arith.constant 0 : i32
    return %c0_i32, %c0_i32_0 : i32, i32
  }
  func.func @transform_5(%arg0: i32) -> (i32, i32) {
    %c0_i32 = arith.constant 0 : i32
    %c0_i32_0 = arith.constant 0 : i32
    %c0_i32_1 = arith.constant 0 : i32
    return %c0_i32, %c0_i32_0 : i32, i32
  }
  func.func @transform_6(%arg0: i32) -> (i32, i32) {
    %c0_i32 = arith.constant 0 : i32
    %c0_i32_0 = arith.constant 0 : i32
    %c0_i32_1 = arith.constant 0 : i32
    return %c0_i32, %c0_i32_0 : i32, i32
  }
}

</mosaic_0001>

<bundles_post_ra>
// kernel: message_layer.3
= control target key start
LH: loop header
LB: loop body
LE: loop exit
PB: predicated region body
PF: predicated region fallthrough
CT: control target
= control target key end

     0   :  { %v266_v2 = vmov 0   ;;  %s352_s0 = inlined_call_operand.vmem [shape: f32[16,32], index: 0, kind: input, shape index: {}]   ;;  %s353_s1 = inlined_call_operand.vmem [shape: s32[16,1], index: 1, kind: input, shape index: {}]   ;;  %s354_s2 = inlined_call_operand.vmem [shape: f32[1,128], index: 2, kind: input, shape index: {}]   ;;  %s355_s3 = inlined_call_operand.vmem [shape: f32[32,128], index: 3, kind: input, shape index: {}]   ;;  %s356_s4 = inlined_call_operand.vmem [shape: f32[8,32], index: 4, kind: input, shape index: {}]   ;;  %s357_s5 = inlined_call_operand.hbm [shape: f32[16,32], index: 5, kind: output, shape index: {}]  }
   0x1   :  { %v27_v0 = vld [vmem:[%s353_s1] sm:$0xff]  ;;  %233 = vset.pattern.permute.xlu0 %v266_v2  ;;  %v55_v3 = vld [vmem:[%s355_s3 + $0x8] sm:$0xff]  ;;  %v56_v4 = vld [vmem:[%s355_s3 + $0x10] sm:$0xff] }
   0x2   :  { %v54_v1 = vld [vmem:[%s355_s3] sm:$0xff]  ;;  %v57_v5 = vld [vmem:[%s355_s3 + $0x18] sm:$0xff]  ;;  %30 = vperm.xlu0 %233, %v27_v0  }
   0x3   :  { %v220_v6 = vpack.c.bf16 %v55_v3, %v54_v1  ;;  %v224_v7 = vpack.c.bf16 %v57_v5, %v56_v4 }
   0x4   :  { %10 = vsyncpa [#allocation3], 0  ;;  %v28_v8 = vld [vmem:[%s353_s1 + $0x8] sm:$0xff]  ;;  %v25_v9 = vlaneseq  ;;  %v198_v11 = vld [vmem:[%s354_s2] ss:$0 sm:$0xff]  ;;  %v267_v13 = vmov 1.0  }
   0x5   :  { %221 = vmatprep.subr.bf16.mxu0 %v220_v6  ;;  %v22_v21 = vld [vmem:[%s352_s0 + $0x8] sm:$0xff]  ;;  %v21_v25 = vld [vmem:[%s352_s0] sm:$0xff]  ;;  %vm139_vm2 = vcmask 261120   ;;  %s268_s11 = smov [#allocation2]  }
   0x6   :  { %223 = vmatpush3.bf16.xpose.msra.mxu0 %v220_v6  ;;  %33 = vperm.xlu0 %233, %v28_v8   ;;  %v26_v10 = vand.u32 127, %v25_v9  ;;  %v201_v48 = vld [vmem:[%s356_s4 + $0x3] ss:$0 sm:$0xff]  ;;  %v202_v50 = vld [vmem:[%s356_s4 + $0x4] ss:$0 sm:$0xff]  ;;  %s185_s12 = sshll.u32 %s268_s11, 4  ;;  %s186_s12 = int_to_ptr.vmem [resolvable:$true] %s185_s12 }
   0x7   :  { %225 = vmatprep.subr.bf16.mxu0 %v224_v7  ;;  %s242_s13 = scalar_lea.vmem %s186_s12, 256  ;;  %p247_p1 = scmp.lt.s32.totalorder %s186_s12, %s186_s12 }
   0x8   :  { %p243_p0 = scmp.ne.s32.totalorder %s186_s12, %s242_s13  ;;  %p248_p2 = scmp.lt.s32.totalorder %s242_s13, %s242_s13 }
   0xa   :  { %p249_p3 = por %p248_p2, %p247_p1 }
   0xc   :  { %p250_p4 = pnand %p249_p3, %p243_p0 }
   0xe   :  { %227 = vmatpush3.bf16.xpose.msra.mxu0 %v224_v7 }
  0x81   :  { %v31_v12 = vpop.permute.xlu0 %30 }
  0x82   :  { %vm35_vm0 = vcmp.eq.s32.totalorder %v31_v12, %v26_v10 }
  0x83   :  { %217 = vmatprep.mubr.msk.f32.mxu0 %vm35_vm0, %v267_v13  ;;  %v48_v14 = vsel %vm35_vm0, %v198_v11, 0.0 }
  0x84   :  { %50 = vadd.xlane.f32.xlu1 %v48_v14 }
  0x85   :  { %v34_v15 = vpop.permute.xlu0 %33 }
  0x86   :  { %vm36_vm1 = vcmp.eq.s32.totalorder %v34_v15, %v26_v10 }
  0x87   :  { %218 = vmatmul.mubr.msk.f32.vlgmr.msra.gmra.mrb[0].mxu0 %vm36_vm1, %v267_v13  ;;  %v49_v16 = vsel %vm36_vm1, %v198_v11, 0.0 }
  0x88   :  { %52 = vadd.xlane.f32.xlu1 %v49_v16 }
 0x111   :  { %v51_v17 = vpop.xlane.xlu1 %50 }
 0x115   :  { %v53_v18 = vpop.xlane.xlu1 %52 }
 0x116   :  { %234 = vrcp.f32 %v53_v18 }
 0x117   :  { %236 = vrcp.f32 %v51_v17 }
 0x120   :  { %v235_v19 = vpop.eup %234 }
 0x121   :  { %v237_v22 = vpop.eup %236 }
 0x15a   :  { %v219_v20 = vpop.f32.mrb[0].mxu0 }
 0x15b   :  { %v136_v23 = vmul.f32 %v235_v19, %v219_v20  ;;  %v124_v24 = vpop.f32.mrb[1].mxu0 }
 0x15c   :  { %v134_v26 = vmul.f32 %v237_v22, %v124_v24 }
 0x15d   :  { %v138_v27 = vadd.f32 %v136_v23, %v22_v21 }
 0x15e   :  { %v137_v28 = vadd.f32 %v134_v26, %v21_v25 }
 0x15f   :  { %v143_v29 = vsel %vm139_vm2, %v138_v27, 0.0 }
 0x160   :  { %144 = vadd.xlane.f32.xlu1 %v143_v29  ;;  %v140_v30 = vsel %vm139_vm2, %v137_v28, 0.0 }
 0x161   :  { %141 = vadd.xlane.f32.xlu0 %v140_v30 }
 0x1ed   :  { %v145_v31 = vpop.xlane.xlu1 %144 }
 0x1ee   :  { %v147_v32 = vmul.f32 0.03125, %v145_v31  ;;  %v142_v33 = vpop.xlane.xlu0 %141 }
 0x1ef   :  { %v146_v34 = vmul.f32 0.03125, %v142_v33 }
 0x1f0   :  { %v149_v35 = vsub.f32 %v138_v27, %v147_v32 }
 0x1f1   :  { %v148_v36 = vsub.f32 %v137_v28, %v146_v34 }
 0x1f2   :  { %v151_v39 = vmul.f32 %v149_v35, %v149_v35 }
 0x1f3   :  { %v150_v37 = vmul.f32 %v148_v36, %v148_v36 }
 0x1f4   :  { %v155_v40 = vsel %vm139_vm2, %v151_v39, 0.0 }
 0x1f5   :  { %v152_v38 = vsel %vm139_vm2, %v150_v37, 0.0 }
 0x1f6   :  { %153 = vadd.xlane.f32.xlu1 %v152_v38 }
 0x1fa   :  { %156 = vadd.xlane.f32.xlu1 %v155_v40 }
 0x283   :  { %v154_v41 = vpop.xlane.xlu1 %153 }
 0x284   :  { %v158_v42 = vmul.f32 0.03125, %v154_v41 }
 0x286   :  { %v160_v43 = vadd.f32 1e-05, %v158_v42 }
 0x287   :  { %v157_v44 = vpop.xlane.xlu1 %156 }
 0x288   :  { %238 = vrsqrt.f32 %v160_v43  ;;  %v159_v45 = vmul.f32 0.03125, %v157_v44 }
 0x28a   :  { %v161_v46 = vadd.f32 1e-05, %v159_v45 }
 0x28c   :  { %240 = vrsqrt.f32 %v161_v46 }
 0x292   :  { %v239_v47 = vpop.eup %238 }
 0x293   :  { %v164_v49 = vmul.f32 %v239_v47, %v148_v36 }
 0x295   :  { %v170_v51 = vmul.f32 %v201_v48, %v164_v49 }
 0x296   :  { %v241_v52 = vpop.eup %240 }
 0x297   :  { %v165_v53 = vmul.f32 %v241_v52, %v149_v35  ;;  %v176_v54 = vadd.f32 %v202_v50, %v170_v51 }
 0x299   :  { %v171_v55 = vmul.f32 %v201_v48, %v165_v53  ;;  %178 = vst.msk [vmem:[#allocation2] sm:$0xff] %vm139_vm2, %v176_v54 }
 0x29b   :  { %v177_v56 = vadd.f32 %v202_v50, %v171_v55 }
 0x29d   :  { %179 = vst.msk [vmem:[#allocation2 + $0x8] sm:$0xff] %vm139_vm2, %v177_v56 }
 0x29e   :  { %253 = shalt.err (!%p250_p4)
}
 0x29f   :  { %s254_s15 = scalar_lea.hbm %s357_s5, 256 }
 0x2a0   :  { %p255_p5 = scmp.ne.s32.totalorder %s357_s5, %s254_s15  ;;  %p258_p6 = scmp.lt.u32.totalorder %s254_s15, %s357_s5 }
 0x2a2   :  { %p260_p7 = pnand %p258_p6, %p255_p5 }
 0x2a4   :  { %263 = shalt.err (!%p260_p7)
}
 0x2a5   :  { %s269_s20 = smov 128   ;;  %s270_s21 = smov 8  }
 0x2a6   :  { %191 = dma.vmem_to_hbm [thread:$0]  %s186_s12, 256, %s357_s5, [#allocation3], %s269_s20, %s269_s20, %s270_s21  }
 0x2a7   :  { %264 = dma.done.wait [#allocation3], 256  }
 0x2a8   :  { %265 = vsyncadd [#allocation3], 4294967040 }
 0x2a9   :  { %195 = vsyncpa [#allocation3], 1 }

// kernel: message_layer.2
= control target key start
LH: loop header
LB: loop body
LE: loop exit
PB: predicated region body
PF: predicated region fallthrough
CT: control target
= control target key end

     0   :  { %vm46_vm0 = vcmask 261120   ;;  %v619_v14 = vmov 0   ;;  %v263_v39 = vlaneseq  ;;  %v620_v43 = vmov 1.0|1.0   ;;  %s767_s2 = inlined_call_operand.vmem [shape: f32[32,32], index: 2, kind: input, shape index: {}]   ;;  %s768_s0 = inlined_call_operand.vmem [shape: f32[16,32], index: 0, kind: input, shape index: {}]   ;;  %s769_s3 = inlined_call_operand.vmem [shape: f32[32,32], index: 3, kind: input, shape index: {}]   ;;  %s770_s1 = inlined_call_operand.vmem [shape: s32[16,1], index: 1, kind: input, shape index: {}]   ;;  %s771_s4 = inlined_call_operand.vmem [shape: f32[8,32], index: 4, kind: input, shape index: {}]   ;;  %s772_s5 = inlined_call_operand.vmem [shape: f32[1,128], index: 5, kind: output, shape index: {0}]   ;;  %s773_s6 = inlined_call_operand.vmem [shape: f32[32,128], index: 6, kind: output, shape index: {1}]  }
   0x1   :  { %v38_v0 = vld [vmem:[%s767_s2] sm:$0xff]  ;;  %v39_v1 = vld [vmem:[%s767_s2 + $0x8] sm:$0xff]  ;;  %v40_v2 = vld [vmem:[%s767_s2 + $0x10] sm:$0xff]  ;;  %603 = vset.pattern.permute.xlu1 %v619_v14  ;;  %604 = vset.pattern.permute.xlu0 %v619_v14  ;;  %v621_v49 = vmov -1e+30   ;;  %v622_v50 = vmov 0.0  }
   0x2   :  { %v577_v3 = vpack.c.bf16 %v39_v1, %v38_v0  ;;  %v41_v4 = vld [vmem:[%s767_s2 + $0x18] sm:$0xff]  ;;  %v32_v5 = vld [vmem:[%s768_s0] sm:$0xff]  ;;  %v33_v7 = vld [vmem:[%s768_s0 + $0x8] sm:$0xff]  ;;  %v708_v41 = vand.u32 127, %v263_v39  ;;  %26 = vst [vmem:[#allocation2] sm:$0x1] %v621_v49 }
   0x3   :  { %v581_v6 = vpack.c.bf16 %v41_v4, %v40_v2  ;;  %553 = vmatprep.mubr.msk.f32.mxu0 %vm46_vm0, %v32_v5  ;;  %v160_v8 = vld [vmem:[%s769_s3] sm:$0xff]  ;;  %v161_v9 = vld [vmem:[%s769_s3 + $0x8] sm:$0xff]  ;;  %v162_v11 = vld [vmem:[%s769_s3 + $0x10] sm:$0xff]  ;;  %27 = vst [vmem:[%s772_s5] sm:$0x1] %v622_v50  ;;  %v306_v62 = vshrl.u32 %v263_v39, 7  ;;  %vm393_vm8 = vcmask 130048  }
   0x4   :  { %578 = vmatprep.subr.bf16.mxu0 %v577_v3  ;;  %v585_v10 = vpack.c.bf16 %v161_v9, %v160_v8  ;;  %v163_v12 = vld [vmem:[%s769_s3 + $0x18] sm:$0xff]  ;;  %v265_v15 = vld [vmem:[%s770_s1] sm:$0xff]  ;;  %v266_v16 = vld [vmem:[%s770_s1 + $0x8] sm:$0xff] }
   0x5   :  { %580 = vmatpush3.bf16.msra.mxu0 %v577_v3  ;;  %v589_v13 = vpack.c.bf16 %v163_v12, %v162_v11  ;;  %268 = vperm.xlu1 %603, %v265_v15   ;;  %v507_v17 = vld [vmem:[%s771_s4] ss:$0 sm:$0xff]  ;;  %v512_v32 = vld [vmem:[%s771_s4 + $0x1] ss:$0 sm:$0xff]  ;;  %v513_v44 = vld [vmem:[%s771_s4 + $0x5] ss:$0 sm:$0xff] }
   0x6   :  { %582 = vmatprep.subr.bf16.mxu0 %v581_v6  ;;  %586 = vmatprep.subr.bf16.mxu1 %v585_v10  ;;  %v307_v2 = vsub.s32 0, %v306_v62 }
   0x7   :  { %588 = vmatpush3.bf16.msra.mxu1 %v585_v10 }
   0x8   :  { %590 = vmatprep.subr.bf16.mxu1 %v589_v13 }
   0x9   :  { %584 = vmatpush3.bf16.msra.mxu0 %v581_v6  ;;  %271 = vperm.xlu1 %603, %v266_v16   ;;  %v298_v0 = vld [vmem:[#allocation2] sm:$0x1] }
   0xb   :  { %592 = vmatpush3.bf16.msra.mxu1 %v589_v13 }
   0xc   :  { %554 = vmatmul.mubr.msk.f32.vlgmr.msra.gmra.mrb[0].mxu0 %vm46_vm0, %v33_v7 }
  0x84   :  { %v706_v40 = vpop.permute.xlu1 %268 }
  0x85   :  { %vm273_vm3 = vcmp.eq.s32.totalorder %v706_v40, %v708_v41 }
  0x88   :  { %v712_v42 = vpop.permute.xlu1 %271 }
  0x89   :  { %vm274_vm4 = vcmp.eq.s32.totalorder %v712_v42, %v708_v41 }
  0x8a   :  { %vm593_vm5 = vmpackc.low %vm274_vm4, %vm273_vm3 }
  0x8b   :  { %594 = vmatprep.subr.msk.bf16.mxu0 %vm593_vm5, %v620_v43  ;;  %597 = vmatprep.subr.msk.bf16.mxu1 %vm593_vm5, %v620_v43 }
  0x8c   :  { %596 = vmatpush3.bf16.msk.msra.mxu0 %vm593_vm5, %v620_v43 }
  0xdf   :  { %v555_v18 = vpop.f32.mrb[0].mxu0 }
  0xe0   :  { %v125_v19 = vadd.f32 %v555_v18, %v507_v17  ;;  %v119_v20 = vpop.f32.mrb[1].mxu0 }
  0xe1   :  { %v120_v21 = vadd.f32 %v507_v17, %v119_v20 }
  0xe2   :  { %v132_v22 = vmul.f32 1.442695, %v125_v19  ;;  %vm129_vm1 = vcmp.gt.f32.partialorder %v125_v19, 0.0 }
  0xe3   :  { %v130_v23 = vmul.f32 1.442695, %v120_v21  ;;  %vm128_vm2 = vcmp.gt.f32.partialorder %v120_v21, 0.0 }
  0xe4   :  { %605 = vpow2.f32 %v132_v22 }
  0xe5   :  { %607 = vpow2.f32 %v130_v23 }
  0xee   :  { %v606_v24 = vpop.eup %605 }
  0xef   :  { %v608_v25 = vpop.eup %607  ;;  %v511_v26 = vadd.f32 -1.0, %v606_v24 }
  0xf0   :  { %v510_v27 = vadd.f32 -1.0, %v608_v25 }
  0xf1   :  { %v137_v28 = vmul.f32 1.6732632, %v511_v26 }
  0xf2   :  { %v136_v29 = vmul.f32 1.6732632, %v510_v27 }
  0xf3   :  { %v139_v30 = vsel %vm129_vm1, %v125_v19, %v137_v28  ;;  %v514_v19 = vld [vmem:[%s771_s4 + $0x2] ss:$0 sm:$0xff] }
  0xf4   :  { %v138_v31 = vsel %vm128_vm2, %v120_v21, %v136_v29  ;;  %v141_v33 = vmul.f32 1.050701, %v139_v30 }
  0xf5   :  { %v140_v34 = vmul.f32 1.050701, %v138_v31 }
  0xf6   :  { %v147_v37 = vmul.f32 %v512_v32, %v141_v33 }
  0xf7   :  { %564 = vmatprep.mubr.msk.f32.mxu1 %vm46_vm0, %v140_v34  ;;  %v146_v35 = vmul.f32 %v512_v32, %v140_v34 }
  0xf8   :  { %565 = vmatmul.mubr.msk.f32.vlgmr.msra.gmra.mrb[0].mxu1 %vm46_vm0, %v141_v33  ;;  %v151_v38 = vsel %vm46_vm0, %v147_v37, 0.0 }
  0xf9   :  { %v148_v36 = vsel %vm46_vm0, %v146_v35, 0.0  ;;  %598 = vmatpush3.bf16.msk.msra.mxu1 %vm593_vm5, %v620_v43 }
  0xfa   :  { %149 = vadd.xlane.f32.xlu0 %v148_v36 }
  0xfe   :  { %152 = vadd.xlane.f32.xlu0 %v151_v38 }
 0x187   :  { %v150_v45 = vpop.xlane.xlu0 %149 }
 0x188   :  { %v158_v46 = vadd.f32 %v513_v44, %v150_v45 }
 0x18a   :  { %281 = vperm.xlu0 %604, %v158_v46  }
 0x18b   :  { %v153_v47 = vpop.xlane.xlu0 %152 }
 0x18c   :  { %v159_v48 = vadd.f32 %v513_v44, %v153_v47 }
 0x18e   :  { %286 = vperm.xlu1 %603, %v159_v48  }
 0x1cb   :  { %v566_v51 = vpop.f32.mrb[0].mxu1 }
 0x1cc   :  { %v240_v52 = vpop.f32.mrb[1].mxu1  ;;  %v246_v21 = vadd.f32 %v566_v51, %v514_v19 }
 0x1cd   :  { %v241_v20 = vadd.f32 %v514_v19, %v240_v52 }
 0x1ce   :  { %v253_v23 = vmul.f32 1.442695, %v246_v21  ;;  %vm250_vm7 = vcmp.gt.f32.partialorder %v246_v21, 0.0 }
 0x1cf   :  { %v251_v22 = vmul.f32 1.442695, %v241_v20  ;;  %vm249_vm6 = vcmp.gt.f32.partialorder %v241_v20, 0.0 }
 0x209   :  { %v282_v53 = vpop.permute.xlu0 %281 }
 0x20a   :  { %v289_v55 = vsel %vm273_vm3, %v282_v53, -1e+30 }
 0x20d   :  { %v287_v54 = vpop.permute.xlu1 %286 }
 0x20e   :  { %v290_v56 = vsel %vm274_vm4, %v287_v54, -1e+30 }
 0x20f   :  { %v291_v57 = vmax.f32 %v289_v55, %v290_v56 }
 0x211   :  { %v292_v58 = vrot.slane %v291_v57, 4 }
 0x213   :  { %v293_v59 = vmax.f32 %v291_v57, %v292_v58 }
 0x215   :  { %v294_v60 = vrot.slane %v293_v59, 2 }
 0x217   :  { %v295_v61 = vmax.f32 %v293_v59, %v294_v60 }
 0x219   :  { %v296_v63 = vrot.slane %v295_v61, 1 }
 0x21b   :  { %v297_v1 = vmax.f32 %v295_v61, %v296_v63 }
 0x21d   :  { %v299_v3 = vmax.f32 %v298_v0, %v297_v1 }
 0x21f   :  { %v308_v4 = vrot.slane %v299_v3, %v307_v2  ;;  %v300_v5 = vsub.f32 %v298_v0, %v299_v3  ;;  %303 = vst [vmem:[#allocation2] sm:$0x1] %v299_v3 }
 0x221   :  { %v310_v6 = vsel %vm273_vm3, %v308_v4, 0.0  ;;  %v301_v7 = vmul.f32 1.442695, %v300_v5  ;;  %v311_v8 = vsel %vm274_vm4, %v308_v4, 0.0 }
 0x222   :  { %312 = vadd.xlane.f32.xlu1 %v310_v6 }
 0x223   :  { %609 = vpow2.f32 %v301_v7 }
 0x226   :  { %314 = vadd.xlane.f32.xlu1 %v311_v8 }
 0x22d   :  { %v610_v9 = vpop.eup %609 }
 0x22e   :  { %v353_v10 = vrot.slane %v610_v9, %v307_v2 }
 0x230   :  { %v356_v54 = vmul.f32 0.0, %v353_v10 }
 0x2af   :  { %v313_v11 = vpop.xlane.xlu1 %312 }
 0x2b0   :  { %v316_v12 = vsub.f32 %v158_v46, %v313_v11 }
 0x2b2   :  { %v318_v13 = vmul.f32 1.442695, %v316_v12 }
 0x2b3   :  { %v315_v14 = vpop.xlane.xlu1 %314 }
 0x2b4   :  { %611 = vpow2.f32 %v318_v13  ;;  %v317_v15 = vsub.f32 %v159_v48, %v315_v14  ;;  %v322_v48 = vld [vmem:[%s772_s5] sm:$0x1] }
 0x2b5   :  { %v323_v50 = vmul.f32 %v610_v9, %v322_v48 }
 0x2b6   :  { %v320_v16 = vmul.f32 1.442695, %v317_v15 }
 0x2b8   :  { %613 = vpow2.f32 %v320_v16 }
 0x2b9   :  { %615 = vpow2.f32 %v251_v22 }
 0x2ba   :  { %617 = vpow2.f32 %v253_v23 }
 0x2be   :  { %v612_v17 = vpop.eup %611 }
 0x2bf   :  { %326 = vperm.xlu0 %604, %v612_v17  }
 0x2c2   :  { %v614_v18 = vpop.eup %613 }
 0x2c3   :  { %331 = vperm.xlu1 %603, %v614_v18   ;;  %v616_v24 = vpop.eup %615 }
 0x2c4   :  { %v517_v25 = vadd.f32 -1.0, %v616_v24  ;;  %v618_v26 = vpop.eup %617 }
 0x2c5   :  { %v518_v28 = vadd.f32 -1.0, %v618_v26 }
 0x2c6   :  { %v257_v27 = vmul.f32 1.6732632, %v517_v25 }
 0x2c7   :  { %v258_v30 = vmul.f32 1.6732632, %v518_v28 }
 0x2c8   :  { %v259_v29 = vsel %vm249_vm6, %v241_v20, %v257_v27 }
 0x2c9   :  { %v261_v31 = vmul.f32 1.050701, %v259_v29  ;;  %v260_v33 = vsel %vm250_vm7, %v246_v21, %v258_v30 }
 0x2ca   :  { %v262_v35 = vmul.f32 1.050701, %v260_v33 }
 0x33e   :  { %v327_v32 = vpop.permute.xlu0 %326 }
 0x33f   :  { %v359_v34 = vmul.f32 %v327_v32, %v261_v31  ;;  %v334_v37 = vsel %vm273_vm3, %v327_v32, 0.0 }
 0x341   :  { %361 = vxpose.xlu0.b32.start [1/2] (short) (narrow) %v359_v34, 32 }
 0x342   :  { %v332_v36 = vpop.permute.xlu1 %331 }
 0x343   :  { %v335_v38 = vsel %vm274_vm4, %v332_v36, 0.0  ;;  %v360_v39 = vmul.f32 %v332_v36, %v262_v35 }
 0x344   :  { %v336_v43 = vadd.f32 %v335_v38, %v334_v37 }
 0x345   :  { %362 = vxpose.xlu0.b32.end [2/2] (short) (narrow) %v360_v39, 32 }
 0x346   :  { %v337_v44 = vrot.slane %v336_v43, 4 }
 0x348   :  { %v338_v45 = vadd.f32 %v337_v44, %v336_v43 }
 0x34a   :  { %v339_v46 = vrot.slane %v338_v45, 2 }
 0x34c   :  { %v340_v47 = vadd.f32 %v339_v46, %v338_v45 }
 0x34e   :  { %v341_v49 = vrot.slane %v340_v47, 1 }
 0x350   :  { %v342_v51 = vadd.f32 %v341_v49, %v340_v47 }
 0x352   :  { %v343_v40 = vadd.f32 %v342_v51, %v323_v50 }
 0x354   :  { %344 = vst [vmem:[%s772_s5] sm:$0x1] %v343_v40 }
 0x3c1   :  { %v377_v41 = vpop.trf.xlu0 }
 0x3c2   :  { %571 = vmatprep.mubr.msk.f32.mxu0 %vm393_vm8, %v377_v41 }
 0x3c5   :  { %v378_v42 = vpop.trf.xlu0 }
 0x3c6   :  { %572 = vmatmul.mubr.msk.f32.vlgmr.msra.gmra.mrb[2].mxu0 %vm393_vm8, %v378_v42 }
 0x3c9   :  { %v379_v52 = vpop.trf.xlu0 }
 0x3ca   :  { %574 = vmatprep.mubr.msk.f32.mxu1 %vm393_vm8, %v379_v52 }
 0x3cd   :  { %v380_v53 = vpop.trf.xlu0 }
 0x3ce   :  { %575 = vmatmul.mubr.msk.f32.vlgmr.msra.gmra.mrb[2].mxu1 %vm393_vm8, %v380_v53 }
 0x499   :  { %v573_v55 = vpop.f32.mrb[2].mxu0 }
 0x49a   :  { %v492_v56 = vadd.f32 %v573_v55, %v356_v54  ;;  %v472_v57 = vpop.f32.mrb[3].mxu0 }
 0x49b   :  { %v491_v58 = vadd.f32 %v472_v57, %v356_v54 }
 0x49c   :  { %496 = vst [vmem:[%s773_s6 + $0x8] sm:$0xff] %v492_v56 }
 0x49d   :  { %495 = vst [vmem:[%s773_s6] sm:$0xff] %v491_v58 }
 0x4a1   :  { %v576_v59 = vpop.f32.mrb[2].mxu1 }
 0x4a2   :  { %v494_v60 = vadd.f32 %v576_v59, %v356_v54  ;;  %v482_v61 = vpop.f32.mrb[3].mxu1 }
 0x4a3   :  { %v493_v62 = vadd.f32 %v482_v61, %v356_v54 }
 0x4a4   :  { %498 = vst [vmem:[%s773_s6 + $0x18] sm:$0xff] %v494_v60 }
 0x4a5   :  { %497 = vst [vmem:[%s773_s6 + $0x10] sm:$0xff] %v493_v62 }

</bundles_post_ra>
